<compile_context>
chip_gen: v6e
topology: v6e:2x2x1
jax: 0.10.0
libtpu: 0.0.40
codegen_flags: <defaults>
</compile_context>

<pallas_src>
import functools

import jax
import jax.numpy as jnp
from jax.experimental import pallas as pl
from jax.experimental.pallas import tpu as pltpu


# ----------------------------------------------------------------------------
# Kernels
# ----------------------------------------------------------------------------
def odob_mlp_kernel(xT_ref,                      # [d, TB]  f32
                    w1_ref, b1_ref,              # [M, d] bf16, [M, 1] f32
                    w2_ref, b2_ref,              # [M, M] bf16, [M, 1] f32
                    w3_ref, b3_ref,              # [M, M] bf16, [M, 1] f32
                    w4_ref, b4_ref,              # [1, M] bf16, [1, 1] f32
                    gT_ref,                      # [1, TB] f32 out
                    *, half_k):
    # Batch on lanes: every layer is W @ h with N = TB (lane-dense).
    xT = xT_ref[...].astype(jnp.bfloat16)                                  # [d, TB]
    h = jnp.dot(w1_ref[...], xT, preferred_element_type=jnp.float32)
    h = jax.nn.sigmoid(h + b1_ref[...])                                    # f32 [M, TB]
    h = jnp.dot(w2_ref[...], h.astype(jnp.bfloat16),
                preferred_element_type=jnp.float32)
    h = jax.nn.sigmoid(h + b2_ref[...])
    h = jnp.dot(w3_ref[...], h.astype(jnp.bfloat16),
                preferred_element_type=jnp.float32)
    h = jax.nn.sigmoid(h + b3_ref[...])
    g = jnp.dot(w4_ref[...], h.astype(jnp.bfloat16),
                preferred_element_type=jnp.float32)                        # [1, TB]
    gT_ref[...] = (g + b4_ref[...] + half_k).astype(gT_ref.dtype)


def odob_bins_kernel(bi_ref, b_ref):
    # b[k] = sum_{j < k} bi[j]^2  (prefix-sum with a leading 0), done as a
    # masked broadcast + sublane reduction (no sequential scan needed).
    sq = bi_ref[...] ** 2                                       # (K-1, 1) f32
    km1 = sq.shape[0]
    k = b_ref.shape[1]
    j_idx = jax.lax.broadcasted_iota(jnp.int32, (km1, k), 0)
    k_idx = jax.lax.broadcasted_iota(jnp.int32, (km1, k), 1)
    mask = (j_idx < k_idx).astype(jnp.float32)                  # (K-1, K)
    b_ref[...] = jnp.sum(sq * mask, axis=0, keepdims=True)      # (1, K)


# ----------------------------------------------------------------------------
# Wrapper
# ----------------------------------------------------------------------------
def odob_forward(x, params, K, tb=128):
    """x: [B, d] f32. Returns (g [B, 1] f32, b [K] f32) — matches ODOB.forward."""
    B, d = x.shape
    M = params["w1"].shape[0]
    nb = pl.cdiv(B, tb)
    Bp = nb * tb

    # Present x transposed so the batch lands on the lane axis; pad to tile.
    xT = x.T
    if Bp != B:
        xT = jnp.pad(xT, ((0, 0), (0, Bp - B)))

    # bf16 MXU operands, f32 accumulation / biases / sigmoid.
    w1 = params["w1"].astype(jnp.bfloat16)
    w2 = params["w2"].astype(jnp.bfloat16)
    w3 = params["w3"].astype(jnp.bfloat16)
    w4 = params["w4"].astype(jnp.bfloat16)
    b1, b2, b3, b4 = params["b1"], params["b2"], params["b3"], params["b4"]

    const = lambda i: (0, 0)   # weights/biases: resident across the batch grid

    flops = 2 * Bp * (d * M + 2 * M * M + M)
    transcendentals = 3 * Bp * M
    bytes_accessed = (4 * Bp * d + 4 * Bp                # x in, g out (f32)
                      + 2 * (M * d + 2 * M * M + M)      # bf16 weights
                      + 4 * (3 * M + 1))                 # f32 biases

    gT = pl.pallas_call(
        functools.partial(odob_mlp_kernel, half_k=float(K) / 2.0),
        out_shape=jax.ShapeDtypeStruct((1, Bp), jnp.float32),
        grid_spec=pltpu.PrefetchScalarGridSpec(
            num_scalar_prefetch=0,
            grid=(nb,),
            in_specs=[
                pl.BlockSpec((d, tb), lambda i: (0, i)),     # x^T tile (batch on lanes)
                pl.BlockSpec((M, d), const), pl.BlockSpec((M, 1), const),
                pl.BlockSpec((M, M), const), pl.BlockSpec((M, 1), const),
                pl.BlockSpec((M, M), const), pl.BlockSpec((M, 1), const),
                pl.BlockSpec((1, M), const), pl.BlockSpec((1, 1), const),
            ],
            out_specs=pl.BlockSpec((1, tb), lambda i: (0, i)),
        ),
        compiler_params=pltpu.CompilerParams(
            dimension_semantics=("parallel",)),
        cost_estimate=pl.CostEstimate(
            flops=flops,
            transcendentals=transcendentals,
            bytes_accessed=bytes_accessed),
    )(xT, w1, b1, w2, b2, w3, b3, w4, b4)

    g = gT[:, :B].T                                      # back to [B, 1]

    b_row = pl.pallas_call(
        odob_bins_kernel,
        out_shape=jax.ShapeDtypeStruct((1, K), jnp.float32),
        in_specs=[pl.BlockSpec(memory_space=pltpu.MemorySpace.VMEM)],
        out_specs=pl.BlockSpec(memory_space=pltpu.MemorySpace.VMEM),
    )(params["bi"].reshape(K - 1, 1))

    return g, b_row[0]


# ----------------------------------------------------------------------------
# Params / reference
# ----------------------------------------------------------------------------
def init_params(key, d, M, K):
    """nn.Linear-style init (uniform +-1/sqrt(fan_in)). Weights kept in the
    PyTorch [out, in] layout; biases stored as [out, 1] columns."""
    ks = jax.random.split(key, 8)

    def linear(kw, kb, fan_in, fan_out):
        bound = float(fan_in) ** -0.5
        w = jax.random.uniform(kw, (fan_out, fan_in), jnp.float32, -bound, bound)
        b = jax.random.uniform(kb, (fan_out, 1), jnp.float32, -bound, bound)
        return w, b

    w1, b1 = linear(ks[0], ks[1], d, M)
    w2, b2 = linear(ks[2], ks[3], M, M)
    w3, b3 = linear(ks[4], ks[5], M, M)
    w4, b4 = linear(ks[6], ks[7], M, 1)
    bi = jnp.ones((K - 1,), jnp.float32)   # torch.ones(K - 1)
    return dict(w1=w1, b1=b1, w2=w2, b2=b2, w3=w3, b3=b3, w4=w4, b4=b4, bi=bi)


def odob_reference(x, p, K, *, bf16):
    """Pure-JAX reference. bf16=True mirrors the kernel's MXU-input casts."""
    if bf16:
        def mm(a, w):
            return jnp.dot(a.astype(jnp.bfloat16), w.astype(jnp.bfloat16).T,
                           preferred_element_type=jnp.float32)
    else:
        def mm(a, w):
            return jnp.dot(a, w.T)
    h = jax.nn.sigmoid(mm(x, p["w1"]) + p["b1"].T)
    h = jax.nn.sigmoid(mm(h, p["w2"]) + p["b2"].T)
    h = jax.nn.sigmoid(mm(h, p["w3"]) + p["b3"].T)
    g = mm(h, p["w4"]) + p["b4"].T + K / 2.0
    b = jnp.concatenate([jnp.zeros((1,), jnp.float32), jnp.cumsum(p["bi"] ** 2)])
    return g, b


# ----------------------------------------------------------------------------
# Test
# ----------------------------------------------------------------------------
if __name__ == "__main__":
    d, M, K = 16, 32, 4       # ODOB(d, M, K)
    B = 256                   # small batch; 2 grid steps at TB=128

    key = jax.random.PRNGKey(0)
    kx, kp = jax.random.split(key)
    x = jax.random.normal(kx, (B, d), jnp.float32)
    params = init_params(kp, d, M, K)

    g, b = odob_forward(x, params, K, tb=128)
    g = jax.block_until_ready(g)
    b = jax.block_until_ready(b)

    g_ref_mixed, b_ref = odob_reference(x, params, K, bf16=True)
    g_ref_f32, _ = odob_reference(x, params, K, bf16=False)

    assert g.shape == (B, 1), g.shape
    assert b.shape == (K,), b.shape
    assert jnp.allclose(b, b_ref, atol=1e-6), "bin vector b mismatch"
    assert jnp.allclose(g, g_ref_mixed, atol=1e-2, rtol=1e-2), "g mismatch (bf16 ref)"
    assert jnp.allclose(g, g_ref_f32, atol=5e-2, rtol=5e-2), "g mismatch (f32 ref)"
    print("KERNEL_OK")
</pallas_src>

<mosaic_0001>
module attributes {stable_mosaic.version = 11 : i64} {
  func.func @odob_mlp_kernel(%arg0: i32, %arg1: memref<16x128xf32, #tpu.memory_space<vmem>>, %arg2: memref<32x16xbf16, #tpu.memory_space<vmem>>, %arg3: memref<32x1xf32, #tpu.memory_space<vmem>>, %arg4: memref<32x32xbf16, #tpu.memory_space<vmem>>, %arg5: memref<32x1xf32, #tpu.memory_space<vmem>>, %arg6: memref<32x32xbf16, #tpu.memory_space<vmem>>, %arg7: memref<32x1xf32, #tpu.memory_space<vmem>>, %arg8: memref<1x32xbf16, #tpu.memory_space<vmem>>, %arg9: memref<1x1xf32, #tpu.memory_space<vmem>>, %arg10: memref<1x128xf32, #tpu.memory_space<vmem>>) attributes {dimension_semantics = [#tpu.dimension_semantics<parallel>], iteration_bounds = array<i64: 2>, scalar_prefetch = 0 : i64, scratch_operands = 0 : i64, tpu.core_type = #tpu.core_type<tc>, window_params = [{transform_indices = @transform_0, window_bounds = array<i64: 16, 128>}, {pipeline_mode = #tpu.pipeline_mode<synchronous>, transform_indices = @transform_1, window_bounds = array<i64: 32, 16>}, {pipeline_mode = #tpu.pipeline_mode<synchronous>, transform_indices = @transform_2, window_bounds = array<i64: 32, 1>}, {pipeline_mode = #tpu.pipeline_mode<synchronous>, transform_indices = @transform_3, window_bounds = array<i64: 32, 32>}, {pipeline_mode = #tpu.pipeline_mode<synchronous>, transform_indices = @transform_4, window_bounds = array<i64: 32, 1>}, {pipeline_mode = #tpu.pipeline_mode<synchronous>, transform_indices = @transform_5, window_bounds = array<i64: 32, 32>}, {pipeline_mode = #tpu.pipeline_mode<synchronous>, transform_indices = @transform_6, window_bounds = array<i64: 32, 1>}, {pipeline_mode = #tpu.pipeline_mode<synchronous>, transform_indices = @transform_7, window_bounds = array<i64: 1, 32>}, {pipeline_mode = #tpu.pipeline_mode<synchronous>, transform_indices = @transform_8, window_bounds = array<i64: 1, 1>}, {transform_indices = @transform_9, window_bounds = array<i64: 1, 128>}]} {
    %c0 = arith.constant 0 : index
    %c0_0 = arith.constant 0 : index
    %0 = vector.load %arg1[%c0, %c0_0] : memref<16x128xf32, #tpu.memory_space<vmem>>, vector<16x128xf32>
    %1 = arith.truncf %0 : vector<16x128xf32> to vector<16x128xbf16>
    %c0_1 = arith.constant 0 : index
    %c0_2 = arith.constant 0 : index
    %2 = vector.load %arg2[%c0_1, %c0_2] : memref<32x16xbf16, #tpu.memory_space<vmem>>, vector<32x16xbf16>
    %cst = arith.constant dense<0.000000e+00> : vector<32x128xf32>
    %3 = tpu.matmul %2, %1, %cst {dimension_numbers = #tpu.dot_dimension_numbers<[1], [0], [0], [1], [0, 0, 1, 1], [], []>} : vector<32x16xbf16>, vector<16x128xbf16>, vector<32x128xf32> -> vector<32x128xf32>
    %c0_3 = arith.constant 0 : index
    %c0_4 = arith.constant 0 : index
    %4 = vector.load %arg3[%c0_3, %c0_4] : memref<32x1xf32, #tpu.memory_space<vmem>>, vector<32x1xf32>
    %5 = vector.broadcast %4 : vector<32x1xf32> to vector<32x128xf32>
    %6 = arith.addf %3, %5 : vector<32x128xf32>
    %7 = arith.negf %6 : vector<32x128xf32>
    %8 = math.exp %7 : vector<32x128xf32>
    %cst_5 = arith.constant 1.000000e+00 : f32
    %9 = vector.broadcast %cst_5 : f32 to vector<32x128xf32>
    %10 = arith.addf %9, %8 : vector<32x128xf32>
    %11 = arith.divf %9, %10 : vector<32x128xf32>
    %c0_6 = arith.constant 0 : index
    %c0_7 = arith.constant 0 : index
    %12 = vector.load %arg4[%c0_6, %c0_7] : memref<32x32xbf16, #tpu.memory_space<vmem>>, vector<32x32xbf16>
    %13 = arith.truncf %11 : vector<32x128xf32> to vector<32x128xbf16>
    %cst_8 = arith.constant dense<0.000000e+00> : vector<32x128xf32>
    %14 = tpu.matmul %12, %13, %cst_8 {dimension_numbers = #tpu.dot_dimension_numbers<[1], [0], [0], [1], [0, 0, 1, 1], [], []>} : vector<32x32xbf16>, vector<32x128xbf16>, vector<32x128xf32> -> vector<32x128xf32>
    %c0_9 = arith.constant 0 : index
    %c0_10 = arith.constant 0 : index
    %15 = vector.load %arg5[%c0_9, %c0_10] : memref<32x1xf32, #tpu.memory_space<vmem>>, vector<32x1xf32>
    %16 = vector.broadcast %15 : vector<32x1xf32> to vector<32x128xf32>
    %17 = arith.addf %14, %16 : vector<32x128xf32>
    %18 = arith.negf %17 : vector<32x128xf32>
    %19 = math.exp %18 : vector<32x128xf32>
    %cst_11 = arith.constant 1.000000e+00 : f32
    %20 = vector.broadcast %cst_11 : f32 to vector<32x128xf32>
    %21 = arith.addf %20, %19 : vector<32x128xf32>
    %22 = arith.divf %20, %21 : vector<32x128xf32>
    %c0_12 = arith.constant 0 : index
    %c0_13 = arith.constant 0 : index
    %23 = vector.load %arg6[%c0_12, %c0_13] : memref<32x32xbf16, #tpu.memory_space<vmem>>, vector<32x32xbf16>
    %24 = arith.truncf %22 : vector<32x128xf32> to vector<32x128xbf16>
    %cst_14 = arith.constant dense<0.000000e+00> : vector<32x128xf32>
    %25 = tpu.matmul %23, %24, %cst_14 {dimension_numbers = #tpu.dot_dimension_numbers<[1], [0], [0], [1], [0, 0, 1, 1], [], []>} : vector<32x32xbf16>, vector<32x128xbf16>, vector<32x128xf32> -> vector<32x128xf32>
    %c0_15 = arith.constant 0 : index
    %c0_16 = arith.constant 0 : index
    %26 = vector.load %arg7[%c0_15, %c0_16] : memref<32x1xf32, #tpu.memory_space<vmem>>, vector<32x1xf32>
    %27 = vector.broadcast %26 : vector<32x1xf32> to vector<32x128xf32>
    %28 = arith.addf %25, %27 : vector<32x128xf32>
    %29 = arith.negf %28 : vector<32x128xf32>
    %30 = math.exp %29 : vector<32x128xf32>
    %cst_17 = arith.constant 1.000000e+00 : f32
    %31 = vector.broadcast %cst_17 : f32 to vector<32x128xf32>
    %32 = arith.addf %31, %30 : vector<32x128xf32>
    %33 = arith.divf %31, %32 : vector<32x128xf32>
    %c0_18 = arith.constant 0 : index
    %c0_19 = arith.constant 0 : index
    %34 = vector.load %arg8[%c0_18, %c0_19] : memref<1x32xbf16, #tpu.memory_space<vmem>>, vector<1x32xbf16>
    %35 = arith.truncf %33 : vector<32x128xf32> to vector<32x128xbf16>
    %cst_20 = arith.constant dense<0.000000e+00> : vector<1x128xf32>
    %36 = tpu.matmul %34, %35, %cst_20 {dimension_numbers = #tpu.dot_dimension_numbers<[1], [0], [0], [1], [0, 0, 1, 1], [], []>} : vector<1x32xbf16>, vector<32x128xbf16>, vector<1x128xf32> -> vector<1x128xf32>
    %c0_21 = arith.constant 0 : index
    %c0_22 = arith.constant 0 : index
    %37 = vector.load %arg9[%c0_21, %c0_22] : memref<1x1xf32, #tpu.memory_space<vmem>>, vector<1x1xf32>
    %38 = vector.broadcast %37 : vector<1x1xf32> to vector<1x128xf32>
    %39 = arith.addf %36, %38 : vector<1x128xf32>
    %cst_23 = arith.constant 2.000000e+00 : f32
    %40 = vector.broadcast %cst_23 : f32 to vector<1x128xf32>
    %41 = arith.addf %39, %40 : vector<1x128xf32>
    %c0_24 = arith.constant 0 : index
    %c0_25 = arith.constant 0 : index
    %42 = vector.load %arg10[%c0_24, %c0_25] : memref<1x128xf32, #tpu.memory_space<vmem>>, vector<1x128xf32>
    tpu.vector_store %arg10[%c0_24, %c0_25], %41 {strides = array<i32>} : memref<1x128xf32, #tpu.memory_space<vmem>>, vector<1x128xf32>,
    return
  }
  func.func @transform_0(%arg0: i32) -> (i32, i32) {
    %c0_i32 = arith.constant 0 : i32
    %c0_i32_0 = arith.constant 0 : i32
    return %c0_i32, %arg0 : i32, i32
  }
  func.func @transform_1(%arg0: i32) -> (i32, i32) {
    %c0_i32 = arith.constant 0 : i32
    %c0_i32_0 = arith.constant 0 : i32
    %c0_i32_1 = arith.constant 0 : i32
    return %c0_i32, %c0_i32_0 : i32, i32
  }
  func.func @transform_2(%arg0: i32) -> (i32, i32) {
    %c0_i32 = arith.constant 0 : i32
    %c0_i32_0 = arith.constant 0 : i32
    %c0_i32_1 = arith.constant 0 : i32
    return %c0_i32, %c0_i32_0 : i32, i32
  }
  func.func @transform_3(%arg0: i32) -> (i32, i32) {
    %c0_i32 = arith.constant 0 : i32
    %c0_i32_0 = arith.constant 0 : i32
    %c0_i32_1 = arith.constant 0 : i32
    return %c0_i32, %c0_i32_0 : i32, i32
  }
  func.func @transform_4(%arg0: i32) -> (i32, i32) {
    %c0_i32 = arith.constant 0 : i32
    %c0_i32_0 = arith.constant 0 : i32
    %c0_i32_1 = arith.constant 0 : i32
    return %c0_i32, %c0_i32_0 : i32, i32
  }
  func.func @transform_5(%arg0: i32) -> (i32, i32) {
    %c0_i32 = arith.constant 0 : i32
    %c0_i32_0 = arith.constant 0 : i32
    %c0_i32_1 = arith.constant 0 : i32
    return %c0_i32, %c0_i32_0 : i32, i32
  }
  func.func @transform_6(%arg0: i32) -> (i32, i32) {
    %c0_i32 = arith.constant 0 : i32
    %c0_i32_0 = arith.constant 0 : i32
    %c0_i32_1 = arith.constant 0 : i32
    return %c0_i32, %c0_i32_0 : i32, i32
  }
  func.func @transform_7(%arg0: i32) -> (i32, i32) {
    %c0_i32 = arith.constant 0 : i32
    %c0_i32_0 = arith.constant 0 : i32
    %c0_i32_1 = arith.constant 0 : i32
    return %c0_i32, %c0_i32_0 : i32, i32
  }
  func.func @transform_8(%arg0: i32) -> (i32, i32) {
    %c0_i32 = arith.constant 0 : i32
    %c0_i32_0 = arith.constant 0 : i32
    %c0_i32_1 = arith.constant 0 : i32
    return %c0_i32, %c0_i32_0 : i32, i32
  }
  func.func @transform_9(%arg0: i32) -> (i32, i32) {
    %c0_i32 = arith.constant 0 : i32
    %c0_i32_0 = arith.constant 0 : i32
    return %c0_i32, %arg0 : i32, i32
  }
}

</mosaic_0001>

<bundles_post_ra>
// kernel: tpu_custom_call.1
= control target key start
LH: loop header
LB: loop body
LE: loop exit
PB: predicated region body
PF: predicated region fallthrough
CT: control target
= control target key end

     0   :  { %s1333_s0 = inlined_call_operand.vmem [shape: f32[16,256], index: 0, kind: input, shape index: {}]   ;;  %s1334_s1 = inlined_call_operand.vmem [shape: bf16[32,16], index: 1, kind: input, shape index: {}]   ;;  %s1335_s2 = inlined_call_operand.vmem [shape: f32[32,1], index: 2, kind: input, shape index: {}]   ;;  %s1336_s3 = inlined_call_operand.vmem [shape: bf16[32,32], index: 3, kind: input, shape index: {}]   ;;  %s1337_s4 = inlined_call_operand.vmem [shape: f32[32,1], index: 4, kind: input, shape index: {}]   ;;  %s1338_s5 = inlined_call_operand.vmem [shape: bf16[32,32], index: 5, kind: input, shape index: {}]   ;;  %s1339_s6 = inlined_call_operand.vmem [shape: f32[32,1], index: 6, kind: input, shape index: {}]   ;;  %s1340_s7 = inlined_call_operand.vmem [shape: bf16[1,32], index: 7, kind: input, shape index: {}]   ;;  %s1341_s8 = inlined_call_operand.<no memory space> [shape: f32[1,1], index: 8, kind: input, shape index: {}]   ;;  %s1342_s9 = inlined_call_operand.hbm [shape: f32[1,256], index: 9, kind: output, shape index: {}]  }
   0x1   :  { %v14_v0 = vstv %s1341_s8 }
   0x2   :  { %15 = vst [vmem:[#allocation2] sm:$0x1] %v14_v0 }
   0x3   :  { %16 = vsyncpa [#allocation5], 0 }
   0x4   :  { %18 = vsyncpa [#allocation5 + $0x1], 0  ;;  %s1160_s11 = smov 0   ;;  %s1162_s12 = smov 0  }
   0x5   :  { %s1164_s13 = smov 0   ;;  %s1166_s14 = smov 0  }
   0x6 LB: > { %s863_s8 = sadd.s32 4294967295, %s1101_s14   ;;  %s864_s15 = sadd.s32 4294967294, %s1101_s14   ;;  %s1101_s14 = sphi %s1166_s14, %s1348_s14   ;;  %s1097_s13 = sphi %s1164_s13, %s1347_s13   ;;  %s1093_s12 = sphi %s1162_s12, %s1346_s12   ;;  %s1089_s11 = sphi %s1160_s11, %s1345_s11  }
   0x7   : > { %s1183_s16 = sadd.s32 1, %s1101_s14   ;;  %s31_s17 = sadd.s32 1, %s1097_s13 }
   0x8   : > { %s28_s18 = ssub.s32 %s1101_s14, %s1183_s16  ;;  %p38_p0 = scmp.ne.s32.totalorder %s1097_s13, %s1093_s12 }
   0x9   : > { %p29_p1 = scmp.eq.s32.totalorder %s28_s18, 0  ;;  %p39_p2 = scmp.eq.s32.totalorder %s1101_s14, 0 }
   0xa   : > { %p236_p3 = scmp.eq.s32.totalorder %s863_s8, 1  ;;  %p241_p4 = scmp.ne.s32.totalorder %s1093_s12, %s1089_s11 }
   0xb   : > { %s1196_s19 = scalar_select %p29_p1, %s1097_s13, %s31_s17  }
   0xc   : > { %p40_p5 = por %p39_p2, %p38_p0  ;;  %p1198_p6 = por %p236_p3, %p38_p0 }
   0xd   : > { %p242_p7 = scmp.eq.s32.totalorder %s864_s15, 1  ;;  %p866_p9 = scmp.ge.s32.totalorder %s1101_s14, 2 }
   0xf   : > { %p1202_p8 = por %p242_p7, %p241_p4  ;;  %282 = sbr.rel (%p866_p9) target bundleno = 25 (0x19), region = 48 }
  0x14   : > { %285 = sbr.rel (!%p40_p5) target bundleno = 25 (0x19), region = 52  ;;  %s287_s22 = sand.u32 (%p40_p5), 1, %s1097_s13  }
  0x15   : > { %s868_s23 = sshll.u32 (%p40_p5), %s1101_s14, 3  ;;  %s867_s24 = sshll.u32 (%p40_p5), %s287_s22, 4 }
  0x16   : > { %s291_s27 = scalar_lea.vmem (%p40_p5), %s1333_s0, %s868_s23  ;;  %s289_s28 = scalar_lea.vmem (%p40_p5), [#allocation3], %s867_s24 }
  0x17   : > { %v322_v1 = vld [vmem:[%s291_s27] sm:$0xff] (%p40_p5)  ;;  %v324_v2 = vld [vmem:[%s291_s27 + $0x10] sm:$0xff] (%p40_p5) }
  0x18   : > { %323 = vst [vmem:[%s289_s28] sm:$0xff] (%p40_p5), %v322_v1  ;;  %325 = vst [vmem:[%s289_s28 + $0x8] sm:$0xff] (%p40_p5), %v324_v2 }
  0x19 PF: > { %p869_p10 = scmp.ge.s32.totalorder %s1101_s14, 1  ;;  %p330_p11 = scmp.lt.s32.totalorder %s1101_s14, 3 }
  0x1b   : > { %p331_p12 = pnand %p869_p10, %p330_p11 }
  0x1c   : > { %s1217_s29 = sand.u32 (!%p331_p12), 1, %s1093_s12   ;;  %s896_s18 = sshll.u32 (!%p331_p12), %s863_s8, 4 }
  0x1d   : > { %334 = sbr.rel (%p331_p12) target bundleno = 975 (0x3cf), region = 90  ;;  %s870_s15 = sshll.u32 (!%p331_p12), %s1217_s29, 4 }
  0x1e   : > { %s339_s22 = scalar_lea.vmem (!%p331_p12), [#allocation3], %s870_s15  ;;  %s1290_s26 = scalar_lea.hbm (!%p331_p12), %s1342_s9, %s896_s18 }
  0x1f   : > { %s791_s27 = scalar_lea.sflag (!%p331_p12), [#allocation5], %s1217_s29  ;;  %s1106_s28 = smov (!%p331_p12), [#allocation4]  }
  0x20   : > { %s1045_s30 = sshll.u32 (!%p331_p12), %s1106_s28, 4  ;;  %s1046_s30 = int_to_ptr.vmem [resolvable:$false] %s1045_s30 }
  0x21   : > { %s1047_s10 = scalar_lea.vmem (!%p331_p12), %s1046_s30, 32 }
  0x22   : > { %v987_v3 = vld [vmem:[%s1334_s1] sm:$0xff]   ;;  %vm413_vm0 = vcmask 130048   ;;  %v381_v4 = vld [vmem:[%s1335_s2 + $0x10] sm:$0xff]  ;;  %v1103_v7 = vmov 0   ;;  %v382_v10 = vld [vmem:[%s1335_s2 + $0x18] sm:$0xff]  ;;  %vm533_vm1 = vcmask 261120  }
  0x23   : > { %915 = vmatprep.mubr.msk.bf16.mxu0 %vm413_vm0, %v987_v3  ;;  %v372_v5 = vld [vmem:[%s339_s22] sm:$0xff]  ;;  %v373_v6 = vld [vmem:[%s339_s22 + $0x8] sm:$0xff]  ;;  %985 = vset.pattern.permute.xlu0 %v1103_v7  ;;  %vm1105_vm2 = vmmov 0   ;;  %s370_s22 = scalar_lea.vmem [#allocation4], %s1217_s29 }
  0x24   : > { %986 = vset.pattern.permute.xlu1 %v1103_v7  ;;  %v374_v8 = vpack.c.bf16 %v373_v6, %v372_v5  ;;  %395 = vperm.xlu0 %985, %v381_v4   ;;  %v379_v9 = vld [vmem:[%s1335_s2] sm:$0xff]  ;;  %v988_v11 = vld [vmem:[%s1334_s1 + $0x8] sm:$0xff]   ;;  %v501_v13 = vld [vmem:[%s1337_s4 + $0x10] sm:$0xff]  ;;  %s803_s23 = sshll.u32 %s370_s22, 4  ;;  %s1292_s23 = int_to_ptr.vmem [resolvable:$true] %s803_s23 }
  0x25   : > { %385 = vperm.xlu1 %986, %v379_v9   ;;  %v380_v12 = vld [vmem:[%s1335_s2 + $0x8] sm:$0xff]  ;;  %v502_v14 = vld [vmem:[%s1337_s4 + $0x18] sm:$0xff]  ;;  %v499_v15 = vld [vmem:[%s1337_s4] sm:$0xff]  ;;  %s1041_s8 = scalar_lea.vmem %s1292_s23, 16  ;;  %p1048_p2 = scmp.lt.s32.totalorder %s1292_s23, %s1046_s30 }
  0x26   : > { %913 = vmatprep.subr.bf16.mxu0 %v374_v8  ;;  %v500_v16 = vld [vmem:[%s1337_s4 + $0x8] sm:$0xff]  ;;  %v621_v17 = vld [vmem:[%s1339_s6 + $0x10] sm:$0xff]  ;;  %v622_v18 = vld [vmem:[%s1339_s6 + $0x18] sm:$0xff]  ;;  %p1042_p13 = scmp.ne.s32.totalorder %s1292_s23, %s1041_s8  ;;  %p1049_p3 = scmp.lt.s32.totalorder %s1047_s10, %s1041_s8 }
  0x27   : > { %914 = vmatpush3.bf16.msra.mxu0 %v374_v8  ;;  %v619_v19 = vld [vmem:[%s1339_s6] sm:$0xff]  ;;  %v620_v20 = vld [vmem:[%s1339_s6 + $0x8] sm:$0xff] }
  0x28   : > { %400 = vperm.xlu0 %985, %v382_v10   ;;  %v735_v21 = vld [vmem:[#allocation2] sm:$0x1]  ;;  %v990_v53 = vld [vmem:[%s1336_s3 + $0x8] sm:$0xff]   ;;  %p1043_p0 = pnand %p1042_p13, %p1198_p6  ;;  %p1050_p4 = por %p1049_p3, %p1048_p2 }
  0x29   : > { %390 = vperm.xlu1 %986, %v380_v12   ;;  %v989_v22 = vld [vmem:[%s1336_s3] sm:$0xff]  }
  0x2a   : > { %916 = vmatmul.mubr.msk.bf16.vlgmr.msra.gmra.mxu0 %vm413_vm0, %v988_v11  ;;  %923 = vmatprep.mubr.msk.bf16.mxu1 %vm533_vm1, %v989_v22  ;;  %v991_v54 = vld [vmem:[%s1338_s5] sm:$0xff]   ;;  %v1104_v22 = vmov 0.0   ;;  %p1044_p1 = pneg %p1043_p0 }
  0x2b   : > { %931 = vmatprep.mubr.msk.bf16.mxu0 %vm533_vm1, %v991_v54  ;;  %v741_v54 = vlaneseq }
  0x2c   : > { %515 = vperm.xlu0 %985, %v501_v13   ;;  %p1051_p5 = pnand %p1050_p4, %p1044_p1 }
  0x2d   : > { %520 = vperm.xlu1 %986, %v502_v14  }
  0x30   : > { %505 = vperm.xlu0 %985, %v499_v15  }
  0x31   : > { %510 = vperm.xlu1 %986, %v500_v16  }
  0x34   : > { %635 = vperm.xlu0 %985, %v621_v17  }
  0x35   : > { %640 = vperm.xlu1 %986, %v622_v18  }
  0x38   : > { %625 = vperm.xlu0 %985, %v619_v19  }
  0x39   : > { %630 = vperm.xlu1 %986, %v620_v20  }
  0x3c   : > { %738 = vperm.xlu0 %985, %v735_v21   ;;  %v992_v21 = vld [vmem:[%s1338_s5 + $0x8] sm:$0xff]  }
  0x9f   : > { %v396_v23 = vpop.permute.xlu0 %395 }
  0xa0   : > { %v386_v24 = vpop.permute.xlu1 %385 }
  0xa3   : > { %v401_v30 = vpop.permute.xlu0 %400 }
  0xa4   : > { %v391_v34 = vpop.permute.xlu1 %390 }
  0xa7   : > { %v516_v55 = vpop.permute.xlu0 %515 }
  0xa8   : > { %v521_v56 = vpop.permute.xlu1 %520 }
  0xab   : > { %v506_v59 = vpop.permute.xlu0 %505 }
  0xac   : > { %v511_v2 = vpop.permute.xlu1 %510 }
  0xea   : > { %v917_v25 = vpop.f32.mrf.mxu0 }
  0xeb   : > { %v463_v26 = vadd.f32 %v917_v25, %v396_v23  ;;  %v636_v23 = vpop.permute.xlu0 %635 }
  0xec   : > { %v454_v27 = vpop.f32.mrf.mxu0 }
  0xed   : > { %v877_v28 = vmul.f32 -1.442695, %v463_v26  ;;  %v455_v29 = vadd.f32 %v454_v27, %v386_v24  ;;  %v641_v24 = vpop.permute.xlu1 %640 }
  0xee   : > { %v918_v31 = vpop.f32.mrf.mxu0 }
  0xef   : > { %993 = vpow2.f32 %v877_v28  ;;  %v875_v32 = vmul.f32 -1.442695, %v455_v29  ;;  %v466_v33 = vadd.f32 %v918_v31, %v401_v30  ;;  %v626_v27 = vpop.permute.xlu0 %625 }
  0xf0   : > { %v457_v35 = vpop.f32.mrf.mxu0 }
  0xf1   : > { %995 = vpow2.f32 %v875_v32  ;;  %v878_v36 = vmul.f32 -1.442695, %v466_v33  ;;  %v458_v37 = vadd.f32 %v457_v35, %v391_v34  ;;  %v631_v34 = vpop.permute.xlu1 %630 }
  0xf3   : > { %997 = vpow2.f32 %v878_v36  ;;  %v876_v38 = vmul.f32 -1.442695, %v458_v37 }
  0xf5   : > { %999 = vpow2.f32 %v876_v38 }
  0xfc   : > { %v994_v39 = vpop.eup %993 }
  0xfd   : > { %v483_v41 = vadd.f32 1.0, %v994_v39 }
  0xfe   : > { %v996_v40 = vpop.eup %995 }
  0xff   : > { %v481_v43 = vadd.f32 1.0, %v996_v40  ;;  %1001 = vrcp.f32 %v483_v41 }
 0x100   : > { %v998_v42 = vpop.eup %997 }
 0x101   : > { %v484_v44 = vadd.f32 1.0, %v998_v42 }
 0x102   : > { %v1000_v45 = vpop.eup %999 }
 0x103   : > { %1003 = vrcp.f32 %v484_v44  ;;  %v482_v46 = vadd.f32 1.0, %v1000_v45 }
 0x104   : > { %1005 = vrcp.f32 %v481_v43 }
 0x105   : > { %1007 = vrcp.f32 %v482_v46 }
 0x10c   : > { %v1002_v47 = vpop.eup %1001 }
 0x110   : > { %v1004_v48 = vpop.eup %1003 }
 0x111   : > { %v1006_v49 = vpop.eup %1005  ;;  %v498_v50 = vpack.c.bf16 %v1004_v48, %v1002_v47 }
 0x112   : > { %v1008_v51 = vpop.eup %1007 }
 0x113   : > { %919 = vmatprep.subr.bf16.mxu1 %v498_v50  ;;  %v497_v52 = vpack.c.bf16 %v1008_v51, %v1006_v49 }
 0x114   : > { %920 = vmatpush3.bf16.msra.mxu1 %v498_v50 }
 0x115   : > { %921 = vmatprep.subr.bf16.mxu1 %v497_v52 }
 0x118   : > { %922 = vmatpush3.bf16.msra.mxu1 %v497_v52 }
 0x119   : > { %935 = vmatprep.subr.bf16.mxu1 %v1104_v22 }
 0x11b   : > { %924 = vmatmul.mubr.msk.bf16.vlgmr.msra.gmra.mxu1 %vm533_vm1, %v990_v53  ;;  %v732_v53 = vld [vmem:[%s1340_s7] sm:$0x1] }
 0x11c   : > { %939 = vmatprep.mubr.msk.bf16.mxu1 %vm1105_vm2, %v1104_v22 }
 0x1db   : > { %v925_v57 = vpop.f32.mrf.mxu1 }
 0x1dc   : > { %v583_v58 = vadd.f32 %v925_v57, %v516_v55  ;;  %v742_v55 = vshrl.u32 %v741_v54, 7  ;;  %v739_v57 = vpop.permute.xlu0 %738 }
 0x1dd   : > { %v574_v60 = vpop.f32.mrf.mxu1 }
 0x1de   : > { %v885_v61 = vmul.f32 -1.442695, %v583_v58  ;;  %v575_v62 = vadd.f32 %v574_v60, %v506_v59 }
 0x1df   : > { %v926_v63 = vpop.f32.mrf.mxu1 }
 0x1e0   : > { %1009 = vpow2.f32 %v885_v61  ;;  %v883_v0 = vmul.f32 -1.442695, %v575_v62  ;;  %v586_v1 = vadd.f32 %v926_v63, %v521_v56  ;;  %v743_v56 = vsub.s32 0, %v742_v55 }
 0x1e1   : > { %v577_v3 = vpop.f32.mrf.mxu1 }
 0x1e2   : > { %1011 = vpow2.f32 %v883_v0  ;;  %v886_v4 = vmul.f32 -1.442695, %v586_v1  ;;  %v578_v5 = vadd.f32 %v577_v3, %v511_v2  ;;  %v744_v58 = vrot.slane %v739_v57, %v743_v56 }
 0x1e4   : > { %1013 = vpow2.f32 %v886_v4  ;;  %v884_v6 = vmul.f32 -1.442695, %v578_v5 }
 0x1e6   : > { %1015 = vpow2.f32 %v884_v6 }
 0x1ed   : > { %v1010_v7 = vpop.eup %1009 }
 0x1ee   : > { %v603_v9 = vadd.f32 1.0, %v1010_v7 }
 0x1ef   : > { %v1012_v8 = vpop.eup %1011 }
 0x1f0   : > { %v601_v11 = vadd.f32 1.0, %v1012_v8  ;;  %1017 = vrcp.f32 %v603_v9 }
 0x1f1   : > { %v1014_v10 = vpop.eup %1013 }
 0x1f2   : > { %v604_v12 = vadd.f32 1.0, %v1014_v10 }
 0x1f3   : > { %v1016_v13 = vpop.eup %1015 }
 0x1f4   : > { %1019 = vrcp.f32 %v604_v12  ;;  %v602_v14 = vadd.f32 1.0, %v1016_v13 }
 0x1f5   : > { %1021 = vrcp.f32 %v601_v11 }
 0x1f6   : > { %1023 = vrcp.f32 %v602_v14 }
 0x1fd   : > { %v1018_v15 = vpop.eup %1017 }
 0x201   : > { %v1020_v16 = vpop.eup %1019 }
 0x202   : > { %v1022_v17 = vpop.eup %1021  ;;  %v618_v18 = vpack.c.bf16 %v1020_v16, %v1018_v15 }
 0x203   : > { %v1024_v19 = vpop.eup %1023 }
 0x204   : > { %927 = vmatprep.subr.bf16.mxu0 %v618_v18  ;;  %v617_v20 = vpack.c.bf16 %v1024_v19, %v1022_v17 }
 0x205   : > { %928 = vmatpush3.bf16.msra.mxu0 %v618_v18 }
 0x206   : > { %929 = vmatprep.subr.bf16.mxu0 %v617_v20 }
 0x209   : > { %930 = vmatpush3.bf16.msra.mxu0 %v617_v20 }
 0x20c   : > { %932 = vmatmul.mubr.msk.bf16.vlgmr.msra.gmra.mxu0 %vm533_vm1, %v992_v21 }
 0x2cc   : > { %v933_v25 = vpop.f32.mrf.mxu0 }
 0x2cd   : > { %v702_v26 = vadd.f32 %v933_v25, %v636_v23 }
 0x2ce   : > { %v693_v28 = vpop.f32.mrf.mxu0 }
 0x2cf   : > { %v893_v29 = vmul.f32 -1.442695, %v702_v26  ;;  %v694_v30 = vadd.f32 %v693_v28, %v626_v27 }
 0x2d0   : > { %v934_v31 = vpop.f32.mrf.mxu0 }
 0x2d1   : > { %1025 = vpow2.f32 %v893_v29  ;;  %v891_v32 = vmul.f32 -1.442695, %v694_v30  ;;  %v705_v33 = vadd.f32 %v934_v31, %v641_v24 }
 0x2d2   : > { %v696_v35 = vpop.f32.mrf.mxu0 }
 0x2d3   : > { %v894_v36 = vmul.f32 -1.442695, %v705_v33  ;;  %v697_v37 = vadd.f32 %v696_v35, %v631_v34  ;;  %1027 = vpow2.f32 %v891_v32 }
 0x2d5   : > { %1029 = vpow2.f32 %v894_v36  ;;  %v892_v38 = vmul.f32 -1.442695, %v697_v37 }
 0x2d7   : > { %1031 = vpow2.f32 %v892_v38 }
 0x2de   : > { %v1026_v39 = vpop.eup %1025 }
 0x2df   : > { %v722_v40 = vadd.f32 1.0, %v1026_v39 }
 0x2e0   : > { %v1028_v41 = vpop.eup %1027 }
 0x2e1   : > { %1033 = vrcp.f32 %v722_v40  ;;  %v720_v45 = vadd.f32 1.0, %v1028_v41 }
 0x2e2   : > { %v1030_v42 = vpop.eup %1029 }
 0x2e3   : > { %v723_v43 = vadd.f32 1.0, %v1030_v42 }
 0x2e4   : > { %v1032_v44 = vpop.eup %1031 }
 0x2e5   : > { %1035 = vrcp.f32 %v723_v43  ;;  %v721_v46 = vadd.f32 1.0, %v1032_v44 }
 0x2e7   : > { %1037 = vrcp.f32 %v721_v46 }
 0x2e8   : > { %1039 = vrcp.f32 %v720_v45 }
 0x2ee   : > { %v1034_v47 = vpop.eup %1033 }
 0x2f2   : > { %v1036_v48 = vpop.eup %1035 }
 0x2f3   : > { %v734_v49 = vpack.c.bf16 %v1036_v48, %v1034_v47 }
 0x2f4   : > { %v1038_v50 = vpop.eup %1037 }
 0x2f5   : > { %936 = vmatpush3.bf16.msra.mxu1 %v734_v49  ;;  %v1040_v51 = vpop.eup %1039 }
 0x2f6   : > { %937 = vmatprep.subr.bf16.mxu1 %v1104_v22  ;;  %v733_v52 = vpack.c.bf16 %v1038_v50, %v1040_v51 }
 0x2f9   : > { %938 = vmatpush3.bf16.msra.mxu1 %v733_v52 }
 0x2fc   : > { %940 = vmatmul.mubr.msk.bf16.vlgmr.msra.gmra.mxu1 %vm533_vm1, %v732_v53 }
 0x3bc   : > { %v782_v59 = vpop.f32.mrf.mxu1 }
 0x3bd   : > { %v783_v60 = vadd.f32 %v782_v59, %v744_v58 }
 0x3be   : > { %v941_v61 = vpop.f32.mrf.mxu1 }
 0x3bf   : > { %v788_v62 = vadd.f32 2.0, %v783_v60 }
 0x3c0   : > { %v785_v63 = vpop.f32.mrf.mxu1 }
 0x3c1   : > { %789 = vst [vmem:[%s370_s22] sm:$0x1] %v788_v62 }
 0x3c2   : > { %v942_v0 = vpop.f32.mrf.mxu1 }
 0x3c3   : > { %1054 = shalt.err (!%p1051_p5)
}
 0x3c4   : > { %s1055_s15 = scalar_lea.hbm %s1290_s26, 16  ;;  %s1059_s18 = scalar_lea.hbm %s1342_s9, 32 }
 0x3c5   : > { %p1056_p7 = scmp.ne.s32.totalorder %s1290_s26, %s1055_s15  ;;  %p1060_p12 = scmp.lt.s32.totalorder %s1290_s26, %s1342_s9 }
 0x3c6   : > { %p1061_p13 = scmp.lt.s32.totalorder %s1059_s18, %s1055_s15 }
 0x3c7   : > { %p1057_p10 = pnand %p1056_p7, %p1198_p6 }
 0x3c8   : > { %p1062_p0 = por %p1061_p13, %p1060_p12 }
 0x3c9   : > { %p1058_p11 = pneg %p1057_p10 }
 0x3cb   : > { %p1063_p1 = pnand %p1062_p0, %p1058_p11 }
 0x3cd   : > { %1066 = shalt.err (!%p1063_p1)
}
 0x3ce   : > { %943 = dma.vmem_to_hbm [thread:$0]  (%p1198_p6), %s1292_s23, 16, %s1290_s26, %s791_s27  }
 0x3cf PF: > { %s815_s25 = sand.u32 1, %s1089_s11   ;;  %p946_p2 = pnand %p866_p9, %p1202_p8 }
 0x3d0   : > { %s816_s8 = scalar_lea.sflag [#allocation5], %s815_s25 }
 0x3d1   : > { %p947_p3 = pneg %p946_p2 }
 0x3d3   : > { %1084 = dma.done.wait (%p947_p3), %s816_s8, 16  }
 0x3d4   : > { %1086 = vsyncadd (%p947_p3), %s816_s8, 4294967280  ;;  %p21_p4 = scmp.ge.s32.totalorder %s1183_s16, 4   ;;  %s1345_s11 = smov %s1093_s12 }
 0x3d5   : > { %s1346_s12 = smov %s1097_s13  ;;  %s1347_s13 = smov %s1196_s19 }
 0x3d6   : > { %s1348_s14 = smov %s1183_s16  ;;  %23 = sbr.rel (!%p21_p4) target bundleno = 6 (0x6), region = 134 }
 0x3db   :  { %820 = vsyncpa [#allocation5], 1 }
 0x3dc   :  { %822 = vsyncpa [#allocation5 + $0x1], 1 }

</bundles_post_ra>
